<compile_context>
chip_gen: v7x
topology: tpu7x:2x2x1
jax: 0.10.0
libtpu: 0.0.40
codegen_flags: <defaults>
</compile_context>

<pallas_src>
import jax
import jax.numpy as jnp
from jax.experimental import pallas as pl
from jax.experimental.pallas import tpu as pltpu


def _round_up(x, m):
    return (x + m - 1) // m * m


def cevi6_kernel(emb_ref, w1_ref, b1_ref, w2_ref, b2_ref, wr_ref, br_ref,
                 rating_ref, q_ref):
    # encode_user_item: Linear -> ReLU -> Linear -> Sigmoid
    # emb_ref already holds concat([user_emb, item_emb]) (bf16); both matmuls
    # take bf16 operands with f32 accumulation on the MXU.
    h = (jnp.dot(emb_ref[...], w1_ref[...],
                 preferred_element_type=jnp.float32) + b1_ref[...])
    h = jnp.maximum(h, 0.0)                                        # ReLU (f32)
    q = jax.nn.sigmoid(
        jnp.dot(h.astype(jnp.bfloat16), w2_ref[...],
                preferred_element_type=jnp.float32) + b2_ref[...])
    q_ref[...] = q.astype(q_ref.dtype)                             # [TB, word_num]

    # Eval path: z = q.
    # TODO(synk): training branch `reparameterize(q, temp)` (gumbel-softmax) is
    # not defined in the provided source; eval semantics only.
    z = q

    # rating: Linear(word_num -> 1) as a VPU multiply + XLU lane reduction
    # (avoids a degenerate N=1 MXU matmul).
    rating_ref[...] = (jnp.sum(z * wr_ref[...], axis=-1, keepdims=True)
                       + br_ref[...])


def _pick_batch_tile(B):
    if B <= 16:
        return B
    # >= 2 grid steps (so the v7x megacore split has work on both TCs),
    # capped at 2048 rows/tile to amortize the ~0.35 us per-step overhead.
    return min(2048, _round_up((B + 1) // 2, 8))


def _vmem_estimate(TB, d_cat, enc_p, word_num):
    # Every VMEM block pads to (8 sublane, 128 lane) tiles.
    def blk(rows, cols, bpe):
        return _round_up(max(rows, 1), 8) * _round_up(max(cols, 1), 128) * bpe

    dbl = 2  # double buffering
    return (dbl * blk(TB, d_cat, 2)                     # emb input (bf16)
            + dbl * blk(TB, word_num, 4)                # q output (f32)
            + dbl * blk(TB, 1, 4)                       # rating output (f32)
            + blk(TB, enc_p, 4)                         # hidden intermediate
            + dbl * (blk(d_cat, enc_p, 2) + blk(1, enc_p, 4)
                     + blk(enc_p, word_num, 2) + blk(1, word_num, 4)
                     + blk(1, word_num, 4) + blk(1, 1, 4)))


@jax.jit
def cevi6_forward(user, item, params):
    """Embedding gather (XLA glue) + Pallas kernel for the MLP hot path (eval)."""
    f32, bf16 = jnp.float32, jnp.bfloat16

    user_emb = params["emb_user"][user]                  # [B, D]
    item_emb = params["emb_item"][item]                  # [B, D]
    # torch.cat([user_emb, item_emb], dim=1): fuses with the gather, so pass a
    # single [B, 2D] operand and keep an unsplit W1 (one K=2D MXU dot).
    emb = jnp.concatenate([user_emb, item_emb], axis=-1).astype(bf16)

    B, d_cat = emb.shape
    enc = params["w1"].shape[1]
    word_num = params["w2"].shape[1]
    enc_p = _round_up(enc, 128)                          # lane-dense hidden width

    w1 = jnp.pad(params["w1"].astype(bf16), ((0, 0), (0, enc_p - enc)))   # [2D, enc_p]
    b1 = jnp.pad(params["b1"].astype(f32), ((0, 0), (0, enc_p - enc)))    # [1, enc_p]
    w2 = jnp.pad(params["w2"].astype(bf16), ((0, enc_p - enc), (0, 0)))   # [enc_p, W]
    b2 = params["b2"].astype(f32)                                         # [1, W]
    wr = params["wr"].astype(f32).T                                       # [1, W]
    br = params["br"].astype(f32)                                         # [1, 1]

    TB = _pick_batch_tile(B)
    grid = (pl.cdiv(B, TB),)

    vmem_limit = int(min(48 * 2**20,
                         max(8 * 2**20,
                             2 * _vmem_estimate(TB, d_cat, enc_p, word_num))))

    cost = pl.CostEstimate(
        flops=2 * B * (d_cat * enc_p + enc_p * word_num + word_num),
        transcendentals=B * word_num,
        bytes_accessed=(2 * B * d_cat                          # emb (bf16)
                        + 2 * (d_cat * enc_p + enc_p * word_num)  # weights (bf16)
                        + 4 * (enc_p + 2 * word_num + 1)        # biases / wr / br
                        + 4 * B * word_num + 4 * B),            # q + rating out
    )

    rating, q = pl.pallas_call(
        cevi6_kernel,
        grid=grid,
        in_specs=[
            pl.BlockSpec((TB, d_cat), lambda i: (i, 0)),           # [ue | ie]
            pl.BlockSpec((d_cat, enc_p), lambda i: (0, 0)),        # w1 (resident)
            pl.BlockSpec((1, enc_p), lambda i: (0, 0)),            # b1
            pl.BlockSpec((enc_p, word_num), lambda i: (0, 0)),     # w2
            pl.BlockSpec((1, word_num), lambda i: (0, 0)),         # b2
            pl.BlockSpec((1, word_num), lambda i: (0, 0)),         # wr (row)
            pl.BlockSpec((1, 1), lambda i: (0, 0)),                # br
        ],
        out_specs=(
            pl.BlockSpec((TB, 1), lambda i: (i, 0)),               # rating
            pl.BlockSpec((TB, word_num), lambda i: (i, 0)),        # q (logical width)
        ),
        out_shape=(
            jax.ShapeDtypeStruct((B, 1), jnp.float32),
            jax.ShapeDtypeStruct((B, word_num), jnp.float32),
        ),
        compiler_params=pltpu.CompilerParams(
            dimension_semantics=("parallel",),
            vmem_limit_bytes=vmem_limit,
        ),
        cost_estimate=cost,
    )(emb, w1, b1, w2, b2, wr, br)

    return rating, q


def init_params(key, *, word_num, user_num, item_num, ui_dim, encode_n):
    ks = jax.random.split(key, 7)
    s = 0.02
    return {
        "emb_user": jax.random.normal(ks[0], (user_num, ui_dim), jnp.float32) * s,
        "emb_item": jax.random.normal(ks[1], (item_num, ui_dim), jnp.float32) * s,
        # encode_user_item
        "w1": jax.random.normal(ks[2], (2 * ui_dim, encode_n), jnp.float32) * s,
        "b1": jnp.zeros((1, encode_n), jnp.float32),
        "w2": jax.random.normal(ks[3], (encode_n, word_num), jnp.float32) * s,
        "b2": jnp.zeros((1, word_num), jnp.float32),
        # rating
        "wr": jax.random.normal(ks[4], (word_num, 1), jnp.float32) * s,
        "br": jnp.zeros((1, 1), jnp.float32),
    }


def reference_forward(user, item, params):
    """Pure-JAX f32 reference (eval path) for sanity check."""
    user_emb = params["emb_user"][user]
    item_emb = params["emb_item"][item]
    x = jnp.concatenate([user_emb, item_emb], axis=1)
    h = jnp.maximum(x @ params["w1"] + params["b1"], 0.0)
    q = jax.nn.sigmoid(h @ params["w2"] + params["b2"])
    rating = q @ params["wr"] + params["br"]
    return rating, q


if __name__ == "__main__":
    key = jax.random.PRNGKey(0)
    k_param, k_user, k_item, k_user2, k_item2 = jax.random.split(key, 5)

    # Small synthetic config matching the module's hyper-parameters.
    word_num, user_num, item_num = 64, 10, 20
    ui_dim, encode_n = 16, 32

    params = init_params(k_param, word_num=word_num, user_num=user_num,
                         item_num=item_num, ui_dim=ui_dim, encode_n=encode_n)

    # Tolerance accounts for bf16 MXU operands (f32 accumulate).
    TOL = 2e-3

    # Case 1: tiny batch (single grid step).
    B = 8
    user = jax.random.randint(k_user, (B,), 0, user_num, dtype=jnp.int32)
    item = jax.random.randint(k_item, (B,), 0, item_num, dtype=jnp.int32)

    rating, q = cevi6_forward(user, item, params)
    rating = jax.block_until_ready(rating)
    q = jax.block_until_ready(q)

    ref_rating, ref_q = reference_forward(user, item, params)
    assert rating.shape == (B, 1) and q.shape == (B, word_num)
    assert jnp.allclose(rating, ref_rating, atol=TOL)
    assert jnp.allclose(q, ref_q, atol=TOL)

    # Case 2: larger batch exercising the multi-step pipelined grid (2 steps).
    B2 = 1024
    user2 = jax.random.randint(k_user2, (B2,), 0, user_num, dtype=jnp.int32)
    item2 = jax.random.randint(k_item2, (B2,), 0, item_num, dtype=jnp.int32)

    rating2, q2 = cevi6_forward(user2, item2, params)
    rating2 = jax.block_until_ready(rating2)
    q2 = jax.block_until_ready(q2)

    ref_rating2, ref_q2 = reference_forward(user2, item2, params)
    assert rating2.shape == (B2, 1) and q2.shape == (B2, word_num)
    assert jnp.allclose(rating2, ref_rating2, atol=TOL)
    assert jnp.allclose(q2, ref_q2, atol=TOL)

    print("KERNEL_OK")
</pallas_src>

<mosaic_0001>
module attributes {stable_mosaic.version = 11 : i64} {
  func.func @cevi6_kernel(%arg0: i32, %arg1: memref<8x32xbf16, #tpu.memory_space<vmem>>, %arg2: memref<32x128xbf16, #tpu.memory_space<vmem>>, %arg3: memref<1x128xf32, #tpu.memory_space<vmem>>, %arg4: memref<128x64xbf16, #tpu.memory_space<vmem>>, %arg5: memref<1x64xf32, #tpu.memory_space<vmem>>, %arg6: memref<1x64xf32, #tpu.memory_space<vmem>>, %arg7: memref<1x1xf32, #tpu.memory_space<vmem>>, %arg8: memref<8x1xf32, #tpu.memory_space<vmem>>, %arg9: memref<8x64xf32, #tpu.memory_space<vmem>>) attributes {dimension_semantics = [#tpu.dimension_semantics<parallel>], iteration_bounds = array<i64: 1>, scalar_prefetch = 0 : i64, scratch_operands = 0 : i64, tpu.core_type = #tpu.core_type<tc>, window_params = [{transform_indices = @transform_0, window_bounds = array<i64: 8, 32>}, {pipeline_mode = #tpu.pipeline_mode<synchronous>, transform_indices = @transform_1, window_bounds = array<i64: 32, 128>}, {pipeline_mode = #tpu.pipeline_mode<synchronous>, transform_indices = @transform_2, window_bounds = array<i64: 1, 128>}, {pipeline_mode = #tpu.pipeline_mode<synchronous>, transform_indices = @transform_3, window_bounds = array<i64: 128, 64>}, {pipeline_mode = #tpu.pipeline_mode<synchronous>, transform_indices = @transform_4, window_bounds = array<i64: 1, 64>}, {pipeline_mode = #tpu.pipeline_mode<synchronous>, transform_indices = @transform_5, window_bounds = array<i64: 1, 64>}, {pipeline_mode = #tpu.pipeline_mode<synchronous>, transform_indices = @transform_6, window_bounds = array<i64: 1, 1>}, {transform_indices = @transform_7, window_bounds = array<i64: 8, 1>}, {transform_indices = @transform_8, window_bounds = array<i64: 8, 64>}]} {
    %c0 = arith.constant 0 : index
    %c0_0 = arith.constant 0 : index
    %0 = vector.load %arg1[%c0, %c0_0] : memref<8x32xbf16, #tpu.memory_space<vmem>>, vector<8x32xbf16>
    %c0_1 = arith.constant 0 : index
    %c0_2 = arith.constant 0 : index
    %1 = vector.load %arg2[%c0_1, %c0_2] : memref<32x128xbf16, #tpu.memory_space<vmem>>, vector<32x128xbf16>
    %cst = arith.constant dense<0.000000e+00> : vector<8x128xf32>
    %2 = tpu.matmul %0, %1, %cst {dimension_numbers = #tpu.dot_dimension_numbers<[1], [0], [0], [1], [0, 0, 1, 1], [], []>} : vector<8x32xbf16>, vector<32x128xbf16>, vector<8x128xf32> -> vector<8x128xf32>
    %c0_3 = arith.constant 0 : index
    %c0_4 = arith.constant 0 : index
    %3 = vector.load %arg3[%c0_3, %c0_4] : memref<1x128xf32, #tpu.memory_space<vmem>>, vector<1x128xf32>
    %4 = vector.broadcast %3 : vector<1x128xf32> to vector<8x128xf32>
    %5 = arith.addf %2, %4 : vector<8x128xf32>
    %cst_5 = arith.constant 0.000000e+00 : f32
    %6 = vector.broadcast %cst_5 : f32 to vector<8x128xf32>
    %7 = arith.maximumf %5, %6 : vector<8x128xf32>
    %8 = arith.truncf %7 : vector<8x128xf32> to vector<8x128xbf16>
    %c0_6 = arith.constant 0 : index
    %c0_7 = arith.constant 0 : index
    %9 = vector.load %arg4[%c0_6, %c0_7] : memref<128x64xbf16, #tpu.memory_space<vmem>>, vector<128x64xbf16>
    %cst_8 = arith.constant dense<0.000000e+00> : vector<8x64xf32>
    %10 = tpu.matmul %8, %9, %cst_8 {dimension_numbers = #tpu.dot_dimension_numbers<[1], [0], [0], [1], [0, 0, 1, 1], [], []>} : vector<8x128xbf16>, vector<128x64xbf16>, vector<8x64xf32> -> vector<8x64xf32>
    %c0_9 = arith.constant 0 : index
    %c0_10 = arith.constant 0 : index
    %11 = vector.load %arg5[%c0_9, %c0_10] : memref<1x64xf32, #tpu.memory_space<vmem>>, vector<1x64xf32>
    %12 = vector.broadcast %11 : vector<1x64xf32> to vector<8x64xf32>
    %13 = arith.addf %10, %12 : vector<8x64xf32>
    %14 = arith.negf %13 : vector<8x64xf32>
    %15 = math.exp %14 : vector<8x64xf32>
    %cst_11 = arith.constant 1.000000e+00 : f32
    %16 = vector.broadcast %cst_11 : f32 to vector<8x64xf32>
    %17 = arith.addf %16, %15 : vector<8x64xf32>
    %18 = arith.divf %16, %17 : vector<8x64xf32>
    %c0_12 = arith.constant 0 : index
    %c0_13 = arith.constant 0 : index
    %19 = vector.load %arg9[%c0_12, %c0_13] : memref<8x64xf32, #tpu.memory_space<vmem>>, vector<8x64xf32>
    tpu.vector_store %arg9[%c0_12, %c0_13], %18 {strides = array<i32>} : memref<8x64xf32, #tpu.memory_space<vmem>>, vector<8x64xf32>,
    %c0_14 = arith.constant 0 : index
    %c0_15 = arith.constant 0 : index
    %20 = vector.load %arg6[%c0_14, %c0_15] : memref<1x64xf32, #tpu.memory_space<vmem>>, vector<1x64xf32>
    %21 = vector.broadcast %20 : vector<1x64xf32> to vector<8x64xf32>
    %22 = arith.mulf %18, %21 : vector<8x64xf32>
    %cst_16 = arith.constant dense<0.000000e+00> : vector<8xf32>
    %23 = vector.multi_reduction <add>, %22, %cst_16 [1] : vector<8x64xf32> to vector<8xf32>
    %24 = vector.shape_cast %23 : vector<8xf32> to vector<8x1xf32>
    %c0_17 = arith.constant 0 : index
    %c0_18 = arith.constant 0 : index
    %25 = vector.load %arg7[%c0_17, %c0_18] : memref<1x1xf32, #tpu.memory_space<vmem>>, vector<1x1xf32>
    %26 = vector.broadcast %25 : vector<1x1xf32> to vector<8x1xf32>
    %27 = arith.addf %24, %26 : vector<8x1xf32>
    %c0_19 = arith.constant 0 : index
    %c0_20 = arith.constant 0 : index
    %28 = vector.load %arg8[%c0_19, %c0_20] : memref<8x1xf32, #tpu.memory_space<vmem>>, vector<8x1xf32>
    tpu.vector_store %arg8[%c0_19, %c0_20], %27 {strides = array<i32>} : memref<8x1xf32, #tpu.memory_space<vmem>>, vector<8x1xf32>,
    return
  }
  func.func @transform_0(%arg0: i32) -> (i32, i32) {
    %c0_i32 = arith.constant 0 : i32
    %c0_i32_0 = arith.constant 0 : i32
    return %arg0, %c0_i32 : i32, i32
  }
  func.func @transform_1(%arg0: i32) -> (i32, i32) {
    %c0_i32 = arith.constant 0 : i32
    %c0_i32_0 = arith.constant 0 : i32
    %c0_i32_1 = arith.constant 0 : i32
    return %c0_i32, %c0_i32_0 : i32, i32
  }
  func.func @transform_2(%arg0: i32) -> (i32, i32) {
    %c0_i32 = arith.constant 0 : i32
    %c0_i32_0 = arith.constant 0 : i32
    %c0_i32_1 = arith.constant 0 : i32
    return %c0_i32, %c0_i32_0 : i32, i32
  }
  func.func @transform_3(%arg0: i32) -> (i32, i32) {
    %c0_i32 = arith.constant 0 : i32
    %c0_i32_0 = arith.constant 0 : i32
    %c0_i32_1 = arith.constant 0 : i32
    return %c0_i32, %c0_i32_0 : i32, i32
  }
  func.func @transform_4(%arg0: i32) -> (i32, i32) {
    %c0_i32 = arith.constant 0 : i32
    %c0_i32_0 = arith.constant 0 : i32
    %c0_i32_1 = arith.constant 0 : i32
    return %c0_i32, %c0_i32_0 : i32, i32
  }
  func.func @transform_5(%arg0: i32) -> (i32, i32) {
    %c0_i32 = arith.constant 0 : i32
    %c0_i32_0 = arith.constant 0 : i32
    %c0_i32_1 = arith.constant 0 : i32
    return %c0_i32, %c0_i32_0 : i32, i32
  }
  func.func @transform_6(%arg0: i32) -> (i32, i32) {
    %c0_i32 = arith.constant 0 : i32
    %c0_i32_0 = arith.constant 0 : i32
    %c0_i32_1 = arith.constant 0 : i32
    return %c0_i32, %c0_i32_0 : i32, i32
  }
  func.func @transform_7(%arg0: i32) -> (i32, i32) {
    %c0_i32 = arith.constant 0 : i32
    %c0_i32_0 = arith.constant 0 : i32
    return %arg0, %c0_i32 : i32, i32
  }
  func.func @transform_8(%arg0: i32) -> (i32, i32) {
    %c0_i32 = arith.constant 0 : i32
    %c0_i32_0 = arith.constant 0 : i32
    return %arg0, %c0_i32 : i32, i32
  }
}

</mosaic_0001>

<bundles_post_ra>
// kernel: cevi6_forward.1
= control target key start
LH: loop header
LB: loop body
LE: loop exit
PB: predicated region body
PF: predicated region fallthrough
CT: control target
= control target key end

     0   :  { %s465_s0 = inlined_call_operand.vmem [shape: bf16[8,32], index: 0, kind: input, shape index: {}]   ;;  %s466_s1 = inlined_call_operand.vmem [shape: bf16[32,128], index: 1, kind: input, shape index: {}]   ;;  %s467_s2 = inlined_call_operand.vmem [shape: f32[1,128], index: 2, kind: input, shape index: {}]   ;;  %s468_s3 = inlined_call_operand.vmem [shape: bf16[128,64], index: 3, kind: input, shape index: {}]   ;;  %s469_s4 = inlined_call_operand.vmem [shape: f32[1,64], index: 4, kind: input, shape index: {}]   ;;  %s470_s5 = inlined_call_operand.vmem [shape: f32[1,64], index: 5, kind: input, shape index: {}]   ;;  %s471_s6 = inlined_call_operand.<no memory space> [shape: f32[1,1], index: 6, kind: input, shape index: {}]   ;;  %s472_s7 = inlined_call_operand.vmem [shape: f32[8,1], index: 7, kind: output, shape index: {0}]   ;;  %s473_s8 = inlined_call_operand.hbm [shape: f32[8,64], index: 8, kind: output, shape index: {1}]  }
   0x1   :  { %v14_v0 = vstv %s471_s6 }
   0x2   :  { %15 = vst [vmem:[#allocation2] sm:$0x1] %v14_v0 }
   0x3   :  { %v319_v1 = vld [vmem:[%s466_s1] sm:$0xff]   ;;  %v357_v2 = vmov 0.0   ;;  %v320_v3 = vld [vmem:[%s466_s1 + $0x8] sm:$0xff]   ;;  %vm358_vm0 = vmmov 0   ;;  %vm56_vm1 = vcmask 261120   ;;  %v323_v7 = vld [vmem:[%s468_s3 + $0x10] sm:$0xff]  }
   0x4   :  { %288 = vmatprep.subr.bf16.mxu0 %v357_v2  ;;  %296 = vmatprep.subr.bf16.mxu1 %v357_v2  ;;  %v321_v4 = vld [vmem:[%s468_s3] sm:$0xff]   ;;  %v322_v5 = vld [vmem:[%s468_s3 + $0x8] sm:$0xff]  }
   0x5   :  { %289 = vmatpush3.bf16.msra.mxu0 %v319_v1  ;;  %292 = vmatprep.mubr.msk.bf16.mxu0 %vm358_vm0, %v357_v2  ;;  %v32_v6 = vld [vmem:[%s465_s0] sm:$0xf] }
   0x6   :  { %290 = vmatprep.subr.bf16.mxu0 %v357_v2  ;;  %312 = vmatprep.mubr.msk.bf16.mxu1 %vm358_vm0, %v357_v2 }
   0x7   :  { %297 = vmatpush3.bf16.msra.mxu1 %v321_v4 }
   0x8   :  { %298 = vmatprep.subr.bf16.mxu1 %v357_v2 }
   0x9   :  { %291 = vmatpush3.bf16.msra.mxu0 %v320_v3 }
   0xb   :  { %299 = vmatpush3.bf16.msra.mxu1 %v322_v5 }
   0xc   :  { %293 = vmatmul.mubr.msk.bf16.vlgmr.msra.gmra.mrb[0].mxu0 %vm56_vm1, %v32_v6  ;;  %300 = vmatprep.subr.bf16.mxu1 %v357_v2 }
   0xd   :  { %16 = vsyncpa [#allocation4], 0  ;;  %v324_v8 = vld [vmem:[%s468_s3 + $0x18] sm:$0xff]   ;;  %v325_v9 = vld [vmem:[%s468_s3 + $0x20] sm:$0xff]   ;;  %vm219_vm2 = vcmask 523264  }
   0xe   :  { %v326_v10 = vld [vmem:[%s468_s3 + $0x28] sm:$0xff]   ;;  %v327_v11 = vld [vmem:[%s468_s3 + $0x30] sm:$0xff]   ;;  %v328_v12 = vld [vmem:[%s468_s3 + $0x38] sm:$0xff]  }
   0xf   :  { %301 = vmatpush3.bf16.msra.mxu1 %v323_v7  ;;  %v260_v13 = vld [vmem:[%s467_s2] ss:$0 sm:$0xff] }
  0x10   :  { %302 = vmatprep.subr.bf16.mxu1 %v357_v2  ;;  %v264_v21 = vld [vmem:[%s469_s4] ss:$0 sm:$0xff]  ;;  %s359_s4 = smov [#allocation3]  }
  0x11   :  { %v274_v30 = vld [vmem:[%s470_s5] ss:$0 sm:$0xff]  ;;  %s250_s30 = sshll.u32 %s359_s4, 4  ;;  %s251_s30 = int_to_ptr.vmem [resolvable:$true] %s250_s30 }
  0x12   :  { %s333_s9 = scalar_lea.vmem %s251_s30, 128  ;;  %p338_p1 = scmp.lt.s32.totalorder %s251_s30, %s251_s30 }
  0x13   :  { %303 = vmatpush3.bf16.msra.mxu1 %v324_v8  ;;  %p334_p0 = scmp.ne.s32.totalorder %s251_s30, %s333_s9  ;;  %p339_p2 = scmp.lt.s32.totalorder %s333_s9, %s333_s9 }
  0x14   :  { %304 = vmatprep.subr.bf16.mxu1 %v357_v2 }
  0x15   :  { %p340_p3 = por %p339_p2, %p338_p1 }
  0x17   :  { %305 = vmatpush3.bf16.msra.mxu1 %v325_v9  ;;  %p341_p4 = pnand %p340_p3, %p334_p0 }
  0x18   :  { %306 = vmatprep.subr.bf16.mxu1 %v357_v2 }
  0x1b   :  { %307 = vmatpush3.bf16.msra.mxu1 %v326_v10 }
  0x1c   :  { %308 = vmatprep.subr.bf16.mxu1 %v357_v2 }
  0x1f   :  { %309 = vmatpush3.bf16.msra.mxu1 %v327_v11 }
  0x20   :  { %310 = vmatprep.subr.bf16.mxu1 %v357_v2 }
  0x23   :  { %311 = vmatpush3.bf16.msra.mxu1 %v328_v12 }
  0xdf   :  { %v94_v14 = vpop.f32.mrb[0].mxu0 }
  0xe0   :  { %v95_v15 = vadd.f32 %v260_v13, %v94_v14  ;;  %v294_v16 = vpop.f32.mrb[1].mxu0 }
  0xe1   :  { %v97_v17 = vpop.f32.mrb[2].mxu0 }
  0xe2   :  { %v100_v18 = vmax.f32 %v95_v15, 0.0  ;;  %v295_v19 = vpop.f32.mrb[3].mxu0 }
  0xe4   :  { %v101_v20 = vpack.c.bf16 %v100_v18, %v100_v18 }
  0xe6   :  { %313 = vmatmul.mubr.bf16.vlgmr.msra.gmra.mrb[0].mxu1 %v101_v20 }
 0x1b9   :  { %v207_v22 = vpop.f32.mrb[0].mxu1 }
 0x1ba   :  { %v208_v23 = vadd.f32 %v264_v21, %v207_v22  ;;  %v314_v24 = vpop.f32.mrb[1].mxu1 }
 0x1bb   :  { %v210_v25 = vpop.f32.mrb[2].mxu1 }
 0x1bc   :  { %v273_v26 = vmul.f32 -1.442695, %v208_v23  ;;  %v315_v27 = vpop.f32.mrb[3].mxu1 }
 0x1be   :  { %329 = vpow2.f32 %v273_v26 }
 0x1c8   :  { %v330_v28 = vpop.eup %329 }
 0x1c9   :  { %v216_v29 = vadd.f32 1.0, %v330_v28 }
 0x1cb   :  { %331 = vrcp.f32 %v216_v29 }
 0x1d5   :  { %v332_v31 = vpop.eup %331 }
 0x1d6   :  { %v228_v32 = vmul.f32 %v332_v31, %v274_v30  ;;  %220 = vst.msk [vmem:[#allocation3] sm:$0xff] %vm219_vm2, %v332_v31 }
 0x1d8   :  { %v229_v33 = vsel %vm219_vm2, %v228_v32, 0.0 }
 0x1d9   :  { %230 = vadd.xlane.f32.xlu0 %v229_v33 }
 0x1da   :  { %344 = shalt.err (!%p341_p4)
}
 0x1db   :  { %s345_s12 = scalar_lea.hbm %s473_s8, 128 }
 0x1dc   :  { %p346_p5 = scmp.ne.s32.totalorder %s473_s8, %s345_s12  ;;  %p349_p6 = scmp.lt.u32.totalorder %s345_s12, %s473_s8 }
 0x1de   :  { %p351_p7 = pnand %p349_p6, %p346_p5 }
 0x1e0   :  { %354 = shalt.err (!%p351_p7)
}
 0x1e1   :  { %253 = dma.vmem_to_hbm [thread:$0]  %s251_s30, 128, %s473_s8, [#allocation4]   ;;  %v275_v34 = vld [vmem:[#allocation2] ss:$0 sm:$0xff]  ;;  %vm240_vm3 = vcmask 7168  }
 0x266   :  { %v231_v35 = vpop.xlane.xlu0 %230 }
 0x267   :  { %v239_v36 = vadd.f32 %v275_v34, %v231_v35 }
 0x269   :  { %241 = vst.msk [vmem:[%s472_s7] sm:$0xff] %vm240_vm3, %v239_v36 }
 0x26a   :  { %355 = dma.done.wait [#allocation4], 128  }
 0x26b   :  { %356 = vsyncadd [#allocation4], 4294967168 }
 0x26c   :  { %259 = vsyncpa [#allocation4], 1 }

</bundles_post_ra>
